<compile_context>
chip_gen: v7x
topology: tpu7x:2x2x1
jax: 0.10.0
libtpu: 0.0.40
codegen_flags: <defaults>
</compile_context>

<pallas_src>
import functools

import jax
import jax.numpy as jnp
from jax.experimental import pallas as pl
from jax.experimental.pallas import tpu as pltpu

POOL_WIN = 9  # nn.AvgPool2d((9, 1), stride=(1, 1)) over the node/frame axis


def _round_up(v, m):
    return ((v + m - 1) // m) * m


def _video_graph_kernel(x_ref, adj_ref, pool_ref, w_ref, b_ref, out_ref, *,
                        bg, fin, hid, gfeat, c_pad, col_w2, col_wfc):
    # Packed parameters (one DMA per slab); static sub-slices only.
    w1 = w_ref[0:fin, 0:hid]                        # (Fin, H)   bf16
    w2 = w_ref[0:hid, col_w2:col_w2 + gfeat]        # (H, G)     bf16
    wfc = w_ref[0:gfeat, col_wfc:col_wfc + c_pad]   # (G, Cpad)  bf16
    b1 = b_ref[0:1, 0:hid]                          # (1, H)     f32
    b2 = b_ref[1:2, 0:gfeat]                        # (1, G)     f32
    bfc = b_ref[2:3, 0:c_pad]                       # (1, Cpad)  f32
    pool = pool_ref[...]                            # (n_out_pad, N_pad) bf16 0/1 band
    inv_win = jnp.float32(1.0 / POOL_WIN)

    # Static unroll over the (tiny) batch group: every contraction is a plain 2D MXU
    # dot with bf16 inputs + f32 accumulation; bias/ReLU epilogue stays f32 on the VPU.
    for b in range(bg):
        xb = x_ref[b]                               # (N_pad, Fin)   bf16
        ab = adj_ref[b]                             # (N_pad, N_pad) bf16

        # --- GraphConvolution 1: relu(adj @ (x @ W1) + b1) ---
        t = jnp.dot(xb, w1, preferred_element_type=jnp.float32)
        t = jnp.dot(ab, t.astype(jnp.bfloat16),
                    preferred_element_type=jnp.float32) + b1
        t = jnp.maximum(t, 0.0)
        # dropout -> identity (eval mode)

        # --- GraphConvolution 2: relu(adj @ (h @ W2) + b2) ---
        t = jnp.dot(t.astype(jnp.bfloat16), w2, preferred_element_type=jnp.float32)
        t = jnp.dot(ab, t.astype(jnp.bfloat16),
                    preferred_element_type=jnp.float32) + b2
        t = jnp.maximum(t, 0.0)                     # (N_pad, G) f32

        # --- AvgPool2d((9,1), stride 1) over nodes: exact 0/1 band matmul, then a
        #     single f32 scale by 1/9 (keeps the band exactly representable in bf16).
        p = jnp.dot(pool, t.astype(jnp.bfloat16),
                    preferred_element_type=jnp.float32) * inv_win   # (n_out_pad, G)

        # --- fc1: lane-padded to a 128-wide output slab (unmasked full-lane stores) ---
        y = jnp.dot(p.astype(jnp.bfloat16), wfc,
                    preferred_element_type=jnp.float32) + bfc
        out_ref[b] = y


def _num_batch_groups(batch):
    """2 grid groups (one per TensorCore) on 2-TC chips (v4/v5p/v7x), else 1."""
    try:
        kind = jax.devices()[0].device_kind.lower().replace(" ", "")
    except Exception:
        return 1
    two_tc = any(tag in kind for tag in ("v4", "v5p", "v7", "7x"))
    return 2 if (two_tc and batch % 2 == 0) else 1


def video_graph_net(x, adj, params):
    """x: (B, N, Fin) f32, adj: (B, N, N) f32 -> (B*(N-8), num_classes) f32."""
    w1, b1, w2, b2, wfc, bfc = params
    B, N, Fin = x.shape
    H = w1.shape[1]
    G = w2.shape[1]
    C = wfc.shape[1]
    n_out = N - POOL_WIN + 1
    assert n_out >= 1, "frame_num must be >= 9 for the hard-coded pool window"

    # Padded geometry: bf16 sublane tile = 16 rows, f32 output tile = 8 rows, 128 lanes.
    N_pad = _round_up(N, 16)
    n_out_pad = _round_up(n_out, 8)
    C_pad = _round_up(C, 128)
    H_col = _round_up(H, 128)
    G_col = _round_up(G, 128)
    R_pad = _round_up(max(Fin, H, G), 16)
    col_w2 = H_col
    col_wfc = H_col + G_col
    W_cols = H_col + G_col + C_pad
    B_cols = max(H_col, G_col, C_pad)

    # ---- host-side, one-time prep: bf16 MXU operands, zero padding, packed params ----
    bf16 = jnp.bfloat16
    x_p = jnp.zeros((B, N_pad, Fin), bf16).at[:, :N, :].set(x.astype(bf16))
    adj_p = jnp.zeros((B, N_pad, N_pad), bf16).at[:, :N, :N].set(adj.astype(bf16))

    rows = jnp.arange(n_out_pad)[:, None]
    cols = jnp.arange(N_pad)[None, :]
    band = (rows < n_out) & (cols >= rows) & (cols < rows + POOL_WIN)
    pool01 = band.astype(bf16)                      # shared across batches, 0/1 exact

    w_pack = (jnp.zeros((R_pad, W_cols), bf16)
              .at[:Fin, 0:H].set(w1.astype(bf16))
              .at[:H, col_w2:col_w2 + G].set(w2.astype(bf16))
              .at[:G, col_wfc:col_wfc + C].set(wfc.astype(bf16)))
    b_pack = (jnp.zeros((8, B_cols), jnp.float32)
              .at[0, :H].set(b1[0])
              .at[1, :G].set(b2[0])
              .at[2, :C].set(bfc[0]))

    groups = _num_batch_groups(B)
    Bg = B // groups

    kernel = functools.partial(
        _video_graph_kernel, bg=Bg, fin=Fin, hid=H, gfeat=G, c_pad=C_pad,
        col_w2=col_w2, col_wfc=col_wfc)

    flops = 2 * B * (N_pad * Fin * H + N_pad * N_pad * H + N_pad * H * G
                     + N_pad * N_pad * G + n_out_pad * N_pad * G
                     + n_out_pad * G * C_pad)
    bytes_accessed = ((x_p.size + adj_p.size + pool01.size + w_pack.size) * 2
                      + b_pack.size * 4 + B * n_out_pad * C_pad * 4)

    out = pl.pallas_call(
        kernel,
        out_shape=jax.ShapeDtypeStruct((B, n_out_pad, C_pad), jnp.float32),
        grid=(groups,),
        in_specs=[
            pl.BlockSpec((Bg, N_pad, Fin),   lambda g: (g, 0, 0)),   # x (padded, bf16)
            pl.BlockSpec((Bg, N_pad, N_pad), lambda g: (g, 0, 0)),   # adj (padded, bf16)
            pl.BlockSpec((n_out_pad, N_pad), lambda g: (0, 0)),      # pooling band
            pl.BlockSpec((R_pad, W_cols),    lambda g: (0, 0)),      # packed W1|W2|Wfc
            pl.BlockSpec((8, B_cols),        lambda g: (0, 0)),      # packed biases
        ],
        out_specs=pl.BlockSpec((Bg, n_out_pad, C_pad), lambda g: (g, 0, 0)),
        compiler_params=pltpu.CompilerParams(
            dimension_semantics=("parallel",)),
        cost_estimate=pl.CostEstimate(
            flops=flops, transcendentals=0, bytes_accessed=bytes_accessed),
    )(x_p, adj_p, pool01, w_pack, b_pack)

    # PyTorch: pool -> view(-1, graph_feature_num) -> fc1  => (b, n_out)-major rows.
    return out[:, :n_out, :C].reshape(B * n_out, C)


def _reference(x, adj, params):
    w1, b1, w2, b2, wfc, bfc = params
    h = jnp.maximum(jnp.einsum("bij,bjf->bif", adj, x @ w1) + b1, 0.0)
    h = jnp.maximum(jnp.einsum("bij,bjf->bif", adj, h @ w2) + b2, 0.0)
    B, N, G = h.shape
    n_out = N - POOL_WIN + 1
    pooled = jnp.stack(
        [h[:, i:i + POOL_WIN, :].mean(axis=1) for i in range(n_out)], axis=1)
    y = pooled @ wfc + bfc
    return y.reshape(B * n_out, -1)


if __name__ == "__main__":
    # Small shapes consistent with the module's forward:
    # nodes N = frame_num = 11 (must be >= 9 for the hardcoded pool window).
    B, N = 2, 11
    dense_feature_num, hidden_num, graph_feature_num, num_classes = 32, 32, 32, 7

    key = jax.random.PRNGKey(0)
    ks = jax.random.split(key, 8)
    x = jax.random.normal(ks[0], (B, N, dense_feature_num), dtype=jnp.float32)
    adj_raw = jax.random.uniform(ks[1], (B, N, N), dtype=jnp.float32)
    adj = 0.5 * (adj_raw + jnp.swapaxes(adj_raw, 1, 2))  # symmetric adjacency

    # Deterministic parameter init (shapes from __init__).
    w1 = jax.random.normal(ks[2], (dense_feature_num, hidden_num), jnp.float32) * 0.05
    b1 = jax.random.normal(ks[3], (1, hidden_num), jnp.float32) * 0.05
    w2 = jax.random.normal(ks[4], (hidden_num, graph_feature_num), jnp.float32) * 0.05
    b2 = jax.random.normal(ks[5], (1, graph_feature_num), jnp.float32) * 0.05
    wfc = jax.random.normal(ks[6], (graph_feature_num, num_classes), jnp.float32) * 0.05
    bfc = jax.random.normal(ks[7], (1, num_classes), jnp.float32) * 0.05
    params = (w1, b1, w2, b2, wfc, bfc)

    out = video_graph_net(x, adj, params)
    out = jax.block_until_ready(out)

    ref = _reference(x, adj, params)
    n_out = N - POOL_WIN + 1
    assert out.shape == (B * n_out, num_classes), out.shape
    # bf16 MXU inputs with f32 accumulation -> loosened tolerance vs. pure-f32 reference.
    assert jnp.allclose(out, ref, atol=2e-2, rtol=2e-2), \
        f"mismatch vs reference, max abs err {float(jnp.max(jnp.abs(out - ref)))}"

    print("KERNEL_OK")
</pallas_src>

<mosaic_0001>
module attributes {stable_mosaic.version = 11 : i64} {
  func.func @_video_graph_kernel(%arg0: i32, %arg1: memref<2x16x32xbf16, #tpu.memory_space<vmem>>, %arg2: memref<2x16x16xbf16, #tpu.memory_space<vmem>>, %arg3: memref<8x16xbf16, #tpu.memory_space<vmem>>, %arg4: memref<32x384xbf16, #tpu.memory_space<vmem>>, %arg5: memref<8x128xf32, #tpu.memory_space<vmem>>, %arg6: memref<2x8x128xf32, #tpu.memory_space<vmem>>) attributes {dimension_semantics = [#tpu.dimension_semantics<parallel>], iteration_bounds = array<i64: 1>, scalar_prefetch = 0 : i64, scratch_operands = 0 : i64, tpu.core_type = #tpu.core_type<tc>, window_params = [{transform_indices = @transform_0, window_bounds = array<i64: 2, 16, 32>}, {transform_indices = @transform_1, window_bounds = array<i64: 2, 16, 16>}, {pipeline_mode = #tpu.pipeline_mode<synchronous>, transform_indices = @transform_2, window_bounds = array<i64: 8, 16>}, {pipeline_mode = #tpu.pipeline_mode<synchronous>, transform_indices = @transform_3, window_bounds = array<i64: 32, 384>}, {pipeline_mode = #tpu.pipeline_mode<synchronous>, transform_indices = @transform_4, window_bounds = array<i64: 8, 128>}, {transform_indices = @transform_5, window_bounds = array<i64: 2, 8, 128>}]} {
    %c0 = arith.constant 0 : index
    %c0_0 = arith.constant 0 : index
    %0 = vector.load %arg4[%c0, %c0_0] : memref<32x384xbf16, #tpu.memory_space<vmem>>, vector<32x32xbf16>
    %c0_1 = arith.constant 0 : index
    %c128 = arith.constant 128 : index
    %1 = vector.load %arg4[%c0_1, %c128] : memref<32x384xbf16, #tpu.memory_space<vmem>>, vector<32x32xbf16>
    %c0_2 = arith.constant 0 : index
    %c256 = arith.constant 256 : index
    %2 = vector.load %arg4[%c0_2, %c256] : memref<32x384xbf16, #tpu.memory_space<vmem>>, vector<32x128xbf16>
    %c0_3 = arith.constant 0 : index
    %c0_4 = arith.constant 0 : index
    %3 = vector.load %arg5[%c0_3, %c0_4] : memref<8x128xf32, #tpu.memory_space<vmem>>, vector<1x32xf32>
    %c1 = arith.constant 1 : index
    %c0_5 = arith.constant 0 : index
    %4 = vector.load %arg5[%c1, %c0_5] : memref<8x128xf32, #tpu.memory_space<vmem>>, vector<1x32xf32>
    %c2 = arith.constant 2 : index
    %c0_6 = arith.constant 0 : index
    %5 = vector.load %arg5[%c2, %c0_6] : memref<8x128xf32, #tpu.memory_space<vmem>>, vector<1x128xf32>
    %c0_7 = arith.constant 0 : index
    %c0_8 = arith.constant 0 : index
    %6 = vector.load %arg3[%c0_7, %c0_8] : memref<8x16xbf16, #tpu.memory_space<vmem>>, vector<8x16xbf16>
    %c0_9 = arith.constant 0 : index
    %c0_10 = arith.constant 0 : index
    %c0_11 = arith.constant 0 : index
    %7 = vector.load %arg1[%c0_9, %c0_10, %c0_11] : memref<2x16x32xbf16, #tpu.memory_space<vmem>>, vector<1x16x32xbf16>
    %8 = vector.shape_cast %7 : vector<1x16x32xbf16> to vector<16x32xbf16>
    %c0_12 = arith.constant 0 : index
    %c0_13 = arith.constant 0 : index
    %c0_14 = arith.constant 0 : index
    %9 = vector.load %arg2[%c0_12, %c0_13, %c0_14] : memref<2x16x16xbf16, #tpu.memory_space<vmem>>, vector<1x16x16xbf16>
    %10 = vector.shape_cast %9 : vector<1x16x16xbf16> to vector<16x16xbf16>
    %cst = arith.constant dense<0.000000e+00> : vector<16x32xf32>
    %11 = tpu.matmul %8, %0, %cst {dimension_numbers = #tpu.dot_dimension_numbers<[1], [0], [0], [1], [0, 0, 1, 1], [], []>} : vector<16x32xbf16>, vector<32x32xbf16>, vector<16x32xf32> -> vector<16x32xf32>
    %12 = arith.truncf %11 : vector<16x32xf32> to vector<16x32xbf16>
    %cst_15 = arith.constant dense<0.000000e+00> : vector<16x32xf32>
    %13 = tpu.matmul %10, %12, %cst_15 {dimension_numbers = #tpu.dot_dimension_numbers<[1], [0], [0], [1], [0, 0, 1, 1], [], []>} : vector<16x16xbf16>, vector<16x32xbf16>, vector<16x32xf32> -> vector<16x32xf32>
    %14 = vector.broadcast %3 : vector<1x32xf32> to vector<16x32xf32>
    %15 = arith.addf %13, %14 : vector<16x32xf32>
    %cst_16 = arith.constant 0.000000e+00 : f32
    %16 = vector.broadcast %cst_16 : f32 to vector<16x32xf32>
    %17 = arith.maximumf %15, %16 : vector<16x32xf32>
    %18 = arith.truncf %17 : vector<16x32xf32> to vector<16x32xbf16>
    %cst_17 = arith.constant dense<0.000000e+00> : vector<16x32xf32>
    %19 = tpu.matmul %18, %1, %cst_17 {dimension_numbers = #tpu.dot_dimension_numbers<[1], [0], [0], [1], [0, 0, 1, 1], [], []>} : vector<16x32xbf16>, vector<32x32xbf16>, vector<16x32xf32> -> vector<16x32xf32>
    %20 = arith.truncf %19 : vector<16x32xf32> to vector<16x32xbf16>
    %cst_18 = arith.constant dense<0.000000e+00> : vector<16x32xf32>
    %21 = tpu.matmul %10, %20, %cst_18 {dimension_numbers = #tpu.dot_dimension_numbers<[1], [0], [0], [1], [0, 0, 1, 1], [], []>} : vector<16x16xbf16>, vector<16x32xbf16>, vector<16x32xf32> -> vector<16x32xf32>
    %22 = vector.broadcast %4 : vector<1x32xf32> to vector<16x32xf32>
    %23 = arith.addf %21, %22 : vector<16x32xf32>
    %cst_19 = arith.constant 0.000000e+00 : f32
    %24 = vector.broadcast %cst_19 : f32 to vector<16x32xf32>
    %25 = arith.maximumf %23, %24 : vector<16x32xf32>
    %26 = arith.truncf %25 : vector<16x32xf32> to vector<16x32xbf16>
    %cst_20 = arith.constant dense<0.000000e+00> : vector<8x32xf32>
    %27 = tpu.matmul %6, %26, %cst_20 {dimension_numbers = #tpu.dot_dimension_numbers<[1], [0], [0], [1], [0, 0, 1, 1], [], []>} : vector<8x16xbf16>, vector<16x32xbf16>, vector<8x32xf32> -> vector<8x32xf32>
    %cst_21 = arith.constant 0.111111112 : f32
    %28 = vector.broadcast %cst_21 : f32 to vector<8x32xf32>
    %29 = arith.mulf %27, %28 : vector<8x32xf32>
    %30 = arith.truncf %29 : vector<8x32xf32> to vector<8x32xbf16>
    %cst_22 = arith.constant dense<0.000000e+00> : vector<8x128xf32>
    %31 = tpu.matmul %30, %2, %cst_22 {dimension_numbers = #tpu.dot_dimension_numbers<[1], [0], [0], [1], [0, 0, 1, 1], [], []>} : vector<8x32xbf16>, vector<32x128xbf16>, vector<8x128xf32> -> vector<8x128xf32>
    %32 = vector.broadcast %5 : vector<1x128xf32> to vector<8x128xf32>
    %33 = arith.addf %31, %32 : vector<8x128xf32>
    %c0_23 = arith.constant 0 : index
    %c0_24 = arith.constant 0 : index
    %c0_25 = arith.constant 0 : index
    %34 = vector.load %arg6[%c0_23, %c0_24, %c0_25] : memref<2x8x128xf32, #tpu.memory_space<vmem>>, vector<1x8x128xf32>
    %35 = vector.shape_cast %34 : vector<1x8x128xf32> to vector<8x128xf32>
    %36 = vector.shape_cast %33 : vector<8x128xf32> to vector<1x8x128xf32>
    tpu.vector_store %arg6[%c0_23, %c0_24, %c0_25], %36 {strides = array<i32>} : memref<2x8x128xf32, #tpu.memory_space<vmem>>, vector<1x8x128xf32>,
    %c1_26 = arith.constant 1 : index
    %c0_27 = arith.constant 0 : index
    %c0_28 = arith.constant 0 : index
    %37 = vector.load %arg1[%c1_26, %c0_27, %c0_28] : memref<2x16x32xbf16, #tpu.memory_space<vmem>>, vector<1x16x32xbf16>
    %38 = vector.shape_cast %37 : vector<1x16x32xbf16> to vector<16x32xbf16>
    %c1_29 = arith.constant 1 : index
    %c0_30 = arith.constant 0 : index
    %c0_31 = arith.constant 0 : index
    %39 = vector.load %arg2[%c1_29, %c0_30, %c0_31] : memref<2x16x16xbf16, #tpu.memory_space<vmem>>, vector<1x16x16xbf16>
    %40 = vector.shape_cast %39 : vector<1x16x16xbf16> to vector<16x16xbf16>
    %cst_32 = arith.constant dense<0.000000e+00> : vector<16x32xf32>
    %41 = tpu.matmul %38, %0, %cst_32 {dimension_numbers = #tpu.dot_dimension_numbers<[1], [0], [0], [1], [0, 0, 1, 1], [], []>} : vector<16x32xbf16>, vector<32x32xbf16>, vector<16x32xf32> -> vector<16x32xf32>
    %42 = arith.truncf %41 : vector<16x32xf32> to vector<16x32xbf16>
    %cst_33 = arith.constant dense<0.000000e+00> : vector<16x32xf32>
    %43 = tpu.matmul %40, %42, %cst_33 {dimension_numbers = #tpu.dot_dimension_numbers<[1], [0], [0], [1], [0, 0, 1, 1], [], []>} : vector<16x16xbf16>, vector<16x32xbf16>, vector<16x32xf32> -> vector<16x32xf32>
    %44 = vector.broadcast %3 : vector<1x32xf32> to vector<16x32xf32>
    %45 = arith.addf %43, %44 : vector<16x32xf32>
    %cst_34 = arith.constant 0.000000e+00 : f32
    %46 = vector.broadcast %cst_34 : f32 to vector<16x32xf32>
    %47 = arith.maximumf %45, %46 : vector<16x32xf32>
    %48 = arith.truncf %47 : vector<16x32xf32> to vector<16x32xbf16>
    %cst_35 = arith.constant dense<0.000000e+00> : vector<16x32xf32>
    %49 = tpu.matmul %48, %1, %cst_35 {dimension_numbers = #tpu.dot_dimension_numbers<[1], [0], [0], [1], [0, 0, 1, 1], [], []>} : vector<16x32xbf16>, vector<32x32xbf16>, vector<16x32xf32> -> vector<16x32xf32>
    %50 = arith.truncf %49 : vector<16x32xf32> to vector<16x32xbf16>
    %cst_36 = arith.constant dense<0.000000e+00> : vector<16x32xf32>
    %51 = tpu.matmul %40, %50, %cst_36 {dimension_numbers = #tpu.dot_dimension_numbers<[1], [0], [0], [1], [0, 0, 1, 1], [], []>} : vector<16x16xbf16>, vector<16x32xbf16>, vector<16x32xf32> -> vector<16x32xf32>
    %52 = vector.broadcast %4 : vector<1x32xf32> to vector<16x32xf32>
    %53 = arith.addf %51, %52 : vector<16x32xf32>
    %cst_37 = arith.constant 0.000000e+00 : f32
    %54 = vector.broadcast %cst_37 : f32 to vector<16x32xf32>
    %55 = arith.maximumf %53, %54 : vector<16x32xf32>
    %56 = arith.truncf %55 : vector<16x32xf32> to vector<16x32xbf16>
    %cst_38 = arith.constant dense<0.000000e+00> : vector<8x32xf32>
    %57 = tpu.matmul %6, %56, %cst_38 {dimension_numbers = #tpu.dot_dimension_numbers<[1], [0], [0], [1], [0, 0, 1, 1], [], []>} : vector<8x16xbf16>, vector<16x32xbf16>, vector<8x32xf32> -> vector<8x32xf32>
    %cst_39 = arith.constant 0.111111112 : f32
    %58 = vector.broadcast %cst_39 : f32 to vector<8x32xf32>
    %59 = arith.mulf %57, %58 : vector<8x32xf32>
    %60 = arith.truncf %59 : vector<8x32xf32> to vector<8x32xbf16>
    %cst_40 = arith.constant dense<0.000000e+00> : vector<8x128xf32>
    %61 = tpu.matmul %60, %2, %cst_40 {dimension_numbers = #tpu.dot_dimension_numbers<[1], [0], [0], [1], [0, 0, 1, 1], [], []>} : vector<8x32xbf16>, vector<32x128xbf16>, vector<8x128xf32> -> vector<8x128xf32>
    %62 = vector.broadcast %5 : vector<1x128xf32> to vector<8x128xf32>
    %63 = arith.addf %61, %62 : vector<8x128xf32>
    %c1_41 = arith.constant 1 : index
    %c0_42 = arith.constant 0 : index
    %c0_43 = arith.constant 0 : index
    %64 = vector.load %arg6[%c1_41, %c0_42, %c0_43] : memref<2x8x128xf32, #tpu.memory_space<vmem>>, vector<1x8x128xf32>
    %65 = vector.shape_cast %64 : vector<1x8x128xf32> to vector<8x128xf32>
    %66 = vector.shape_cast %63 : vector<8x128xf32> to vector<1x8x128xf32>
    tpu.vector_store %arg6[%c1_41, %c0_42, %c0_43], %66 {strides = array<i32>} : memref<2x8x128xf32, #tpu.memory_space<vmem>>, vector<1x8x128xf32>,
    return
  }
  func.func @transform_0(%arg0: i32) -> (i32, i32, i32) {
    %c0_i32 = arith.constant 0 : i32
    %c0_i32_0 = arith.constant 0 : i32
    %c0_i32_1 = arith.constant 0 : i32
    return %arg0, %c0_i32, %c0_i32_0 : i32, i32, i32
  }
  func.func @transform_1(%arg0: i32) -> (i32, i32, i32) {
    %c0_i32 = arith.constant 0 : i32
    %c0_i32_0 = arith.constant 0 : i32
    %c0_i32_1 = arith.constant 0 : i32
    return %arg0, %c0_i32, %c0_i32_0 : i32, i32, i32
  }
  func.func @transform_2(%arg0: i32) -> (i32, i32) {
    %c0_i32 = arith.constant 0 : i32
    %c0_i32_0 = arith.constant 0 : i32
    %c0_i32_1 = arith.constant 0 : i32
    return %c0_i32, %c0_i32_0 : i32, i32
  }
  func.func @transform_3(%arg0: i32) -> (i32, i32) {
    %c0_i32 = arith.constant 0 : i32
    %c0_i32_0 = arith.constant 0 : i32
    %c0_i32_1 = arith.constant 0 : i32
    return %c0_i32, %c0_i32_0 : i32, i32
  }
  func.func @transform_4(%arg0: i32) -> (i32, i32) {
    %c0_i32 = arith.constant 0 : i32
    %c0_i32_0 = arith.constant 0 : i32
    %c0_i32_1 = arith.constant 0 : i32
    return %c0_i32, %c0_i32_0 : i32, i32
  }
  func.func @transform_5(%arg0: i32) -> (i32, i32, i32) {
    %c0_i32 = arith.constant 0 : i32
    %c0_i32_0 = arith.constant 0 : i32
    %c0_i32_1 = arith.constant 0 : i32
    return %arg0, %c0_i32, %c0_i32_0 : i32, i32, i32
  }
}

</mosaic_0001>

<bundles_post_ra>
// kernel: tpu_custom_call.1
= control target key start
LH: loop header
LB: loop body
LE: loop exit
PB: predicated region body
PF: predicated region fallthrough
CT: control target
= control target key end

     0   :  { %10 = vsyncpa [#allocation3], 0  ;;  %s1161_s0 = inlined_call_operand.hbm [shape: bf16[2,16,32], index: 0, kind: input, shape index: {}]   ;;  %s1162_s1 = inlined_call_operand.hbm [shape: bf16[2,16,16], index: 1, kind: input, shape index: {}]   ;;  %s1163_s2 = inlined_call_operand.vmem [shape: bf16[8,16], index: 2, kind: input, shape index: {}]   ;;  %s1164_s3 = inlined_call_operand.hbm [shape: bf16[32,384], index: 3, kind: input, shape index: {}]   ;;  %s1165_s4 = inlined_call_operand.vmem [shape: f32[8,128], index: 4, kind: input, shape index: {}]   ;;  %s1166_s5 = inlined_call_operand.hbm [shape: f32[2,8,128], index: 5, kind: output, shape index: {}]  }
   0x1   :  { %11 = vsyncpa [#allocation6], 0 }
   0x2   :  { %12 = vsyncpa [#allocation4], 0  ;;  %s970_s18 = smov [#allocation5]   ;;  %s971_s20 = smov [#allocation2]  }
   0x3   :  { %s30_s19 = sshll.u32 %s970_s18, 4  ;;  %s18_s21 = sshll.u32 %s971_s20, 4  ;;  %s31_s19 = int_to_ptr.vmem [resolvable:$true] %s30_s19  ;;  %s1012_s21 = int_to_ptr.vmem [resolvable:$true] %s18_s21 }
   0x4   :  { %s876_s24 = scalar_lea.hbm %s1162_s1, 256 }
   0x5   :  { %p877_p0 = scmp.ne.s32.totalorder %s1162_s1, %s876_s24  ;;  %p880_p1 = scmp.lt.u32.totalorder %s876_s24, %s1162_s1 }
   0x7   :  { %p882_p2 = pnand %p880_p1, %p877_p0 }
   0x9   :  { %885 = shalt.err (!%p882_p2)
}
   0xa   :  { %s886_s29 = scalar_lea.vmem %s31_s19, 256  ;;  %p891_p4 = scmp.lt.s32.totalorder %s31_s19, %s31_s19 }
   0xb   :  { %p887_p3 = scmp.ne.s32.totalorder %s31_s19, %s886_s29  ;;  %p892_p5 = scmp.lt.s32.totalorder %s886_s29, %s886_s29 }
   0xd   :  { %p893_p6 = por %p892_p5, %p891_p4 }
   0xf   :  { %p894_p7 = pnand %p893_p6, %p887_p3 }
  0x11   :  { %897 = shalt.err (!%p894_p7)
}
  0x12   :  { %s972_s30 = smov 64   ;;  %s973_s6 = smov 4  }
  0x13   :  { %36 = dma.hbm_to_vmem [thread:$0]  %s1162_s1, 256, %s31_s19, [#allocation6], %s972_s30, %s972_s30, %s973_s6  }
  0x14   :  { %s898_s11 = scalar_lea.hbm %s1161_s0, 256 }
  0x15   :  { %p899_p8 = scmp.ne.s32.totalorder %s1161_s0, %s898_s11  ;;  %p902_p9 = scmp.lt.u32.totalorder %s898_s11, %s1161_s0 }
  0x17   :  { %p904_p10 = pnand %p902_p9, %p899_p8 }
  0x19   :  { %907 = shalt.err (!%p904_p10)
}
  0x1a   :  { %s908_s16 = scalar_lea.vmem %s1012_s21, 256  ;;  %p913_p12 = scmp.lt.s32.totalorder %s1012_s21, %s1012_s21 }
  0x1b   :  { %p909_p11 = scmp.ne.s32.totalorder %s1012_s21, %s908_s16  ;;  %p914_p13 = scmp.lt.s32.totalorder %s908_s16, %s908_s16 }
  0x1d   :  { %p915_p0 = por %p914_p13, %p913_p12 }
  0x1f   :  { %p916_p1 = pnand %p915_p0, %p909_p11 }
  0x21   :  { %919 = shalt.err (!%p916_p1)
}
  0x22   :  { %24 = dma.hbm_to_vmem [thread:$0]  %s1161_s0, 256, %s1012_s21, [#allocation3], %s972_s30, %s972_s30, %s973_s6  }
  0x23   :  { %s974_s18 = smov [#allocation7]   ;;  %s920_s23 = scalar_lea.hbm %s1164_s3, 768 }
  0x24   :  { %s44_s19 = sshll.u32 %s974_s18, 4  ;;  %p921_p2 = scmp.ne.s32.totalorder %s1164_s3, %s920_s23  ;;  %s45_s19 = int_to_ptr.vmem [resolvable:$true] %s44_s19 }
  0x25   :  { %p924_p3 = scmp.lt.u32.totalorder %s920_s23, %s1164_s3 }
  0x27   :  { %p926_p4 = pnand %p924_p3, %p921_p2 }
  0x29   :  { %929 = shalt.err (!%p926_p4)
}
  0x2a   :  { %s930_s28 = scalar_lea.vmem %s45_s19, 768  ;;  %p935_p6 = scmp.lt.s32.totalorder %s45_s19, %s45_s19 }
  0x2b   :  { %p931_p5 = scmp.ne.s32.totalorder %s45_s19, %s930_s28  ;;  %p936_p7 = scmp.lt.s32.totalorder %s930_s28, %s930_s28 }
  0x2d   :  { %p937_p8 = por %p936_p7, %p935_p6 }
  0x2f   :  { %p938_p9 = pnand %p937_p8, %p931_p5 }
  0x31   :  { %941 = shalt.err (!%p938_p9)
}
  0x32   :  { %s975_s0 = smov 192   ;;  %s976_s21 = smov 12  }
  0x33   :  { %50 = dma.hbm_to_vmem [thread:$0]  %s1164_s3, 768, %s45_s19, [#allocation6], %s975_s0, %s975_s0, %s976_s21  }
  0x34   :  { %964 = dma.done.wait [#allocation3], 256  }
  0x35   :  { %965 = vsyncadd [#allocation3], 4294967040 }
  0x36   :  { %966 = dma.done.wait [#allocation6], 1024  }
  0x37   :  { %967 = vsyncadd [#allocation6], 4294966272  ;;  %v977_v0 = vmov 0.0   ;;  %vm978_vm0 = vmmov 0   ;;  %v1061_v1 = vld [vmem:[#allocation7] ss:$12 sps:$4 sm:$0xff]  }
  0x38   :  { %770 = vmatprep.subr.bf16.mxu0 %v977_v0  ;;  %774 = vmatprep.mubr.msk.bf16.mxu0 %vm978_vm0, %v977_v0  ;;  %vm100_vm1 = vcmask 261120   ;;  %v1064_v2 = vld [vmem:[#allocation7 + $0x18] ss:$12 sps:$4 sm:$0xff]   ;;  %v869_v9 = vld [vmem:[#allocation5] sm:$0xff]   ;;  %vm155_vm2 = vcmask 130048   ;;  %v872_v39 = vld [vmem:[#allocation2 + $0x8] sm:$0xff]  }
  0x39   :  { %778 = vmatprep.subr.bf16.mxu1 %v977_v0  ;;  %780 = vmatprep.mubr.msk.bf16.mxu1 %vm978_vm0, %v977_v0  ;;  %v868_v3 = vld [vmem:[#allocation2] sm:$0xff]   ;;  %v871_v11 = vld [vmem:[#allocation7 + $0x1c] ss:$12 sps:$4 sm:$0xff]  }
  0x3a   :  { %771 = vmatpush3.bf16.msra.mxu0 %v1061_v1  ;;  %v870_v10 = vld [vmem:[#allocation7 + $0x4] ss:$12 sps:$4 sm:$0xff]   ;;  %v1081_v12 = vld [vmem:[%s1165_s4] ss:$0 sm:$0xff]  ;;  %v1092_v27 = vld [vmem:[#allocation7 + $0x8] ss:$12 sps:$4 sm:$0xff]  }
  0x3b   :  { %772 = vmatprep.subr.bf16.mxu0 %v977_v0  ;;  %v1099_v28 = vld [vmem:[%s1165_s4 + $0x1] ss:$0 sm:$0xff]  ;;  %v875_v52 = vld [vmem:[#allocation5 + $0x8] sm:$0xff]   ;;  %v728_v53 = vld [vmem:[%s1165_s4 + $0x2] ss:$0 sm:$0xff]  ;;  %s979_s4 = smov [#allocation8]  }
  0x3c   :  { %v1106_v38 = vld [vmem:[%s1163_s2] sm:$0xf]  ;;  %s702_s12 = sshll.u32 %s979_s4, 4  ;;  %s703_s12 = int_to_ptr.vmem [resolvable:$true] %s702_s12 }
  0x3d   :  { %v874_v40 = vld [vmem:[#allocation7 + $0x20] ss:$12 sps:$4 sm:$0xff]   ;;  %s942_s13 = scalar_lea.vmem %s703_s12, 256  ;;  %p947_p11 = scmp.lt.s32.totalorder %s703_s12, %s703_s12 }
  0x3e   :  { %773 = vmatpush3.bf16.msra.mxu0 %v1064_v2  ;;  %p943_p10 = scmp.ne.s32.totalorder %s703_s12, %s942_s13  ;;  %p948_p12 = scmp.lt.s32.totalorder %s942_s13, %s942_s13 }
  0x3f   :  { %792 = vmatprep.subr.bf16.mxu0 %v977_v0 }
  0x40   :  { %p949_p13 = por %p948_p12, %p947_p11 }
  0x41   :  { %775 = vmatmul.mubr.msk.bf16.vlgmr.msra.gmra.mrb[0].mxu0 %vm100_vm1, %v868_v3 }
  0x42   :  { %794 = vmatprep.mubr.msk.bf16.mxu0 %vm978_vm0, %v977_v0  ;;  %p950_p0 = pnand %p949_p13, %p943_p10 }
 0x114   :  { %v138_v4 = vpop.f32.mrb[0].mxu0 }
 0x115   :  { %v776_v5 = vpop.f32.mrb[1].mxu0 }
 0x116   :  { %v141_v6 = vpop.f32.mrb[2].mxu0 }
 0x117   :  { %v145_v7 = vpack.c.bf16 %v141_v6, %v138_v4  ;;  %v777_v8 = vpop.f32.mrb[3].mxu0 }
 0x119   :  { %779 = vmatpush3.bf16.msra.mxu1 %v145_v7 }
 0x11a   :  { %784 = vmatprep.subr.bf16.mxu1 %v977_v0 }
 0x11c   :  { %781 = vmatmul.mubr.msk.bf16.vlgmr.msra.gmra.mrb[0].mxu1 %vm155_vm2, %v869_v9 }
 0x11d   :  { %788 = vmatprep.mubr.msk.bf16.mxu1 %vm978_vm0, %v977_v0  ;;  %785 = vmatpush3.bf16.msra.mxu1 %v870_v10 }
 0x11e   :  { %786 = vmatprep.subr.bf16.mxu1 %v977_v0 }
 0x121   :  { %787 = vmatpush3.bf16.msra.mxu1 %v871_v11 }
 0x122   :  { %798 = vmatprep.subr.bf16.mxu1 %v977_v0 }
 0x1ef   :  { %v193_v13 = vpop.f32.mrb[0].mxu1 }
 0x1f0   :  { %v194_v14 = vadd.f32 %v1081_v12, %v193_v13  ;;  %v782_v15 = vpop.f32.mrb[1].mxu1 }
 0x1f1   :  { %v196_v16 = vpop.f32.mrb[2].mxu1 }
 0x1f2   :  { %v197_v17 = vadd.f32 %v1081_v12, %v196_v16  ;;  %v783_v18 = vpop.f32.mrb[3].mxu1  ;;  %v200_v19 = vmax.f32 %v194_v14, 0.0 }
 0x1f4   :  { %v201_v20 = vmax.f32 %v197_v17, 0.0 }
 0x1f6   :  { %v202_v21 = vpack.c.bf16 %v201_v20, %v200_v19 }
 0x1f8   :  { %789 = vmatmul.mubr.msk.bf16.vlgmr.msra.gmra.mrb[4].mxu1 %vm100_vm1, %v202_v21 }
 0x1f9   :  { %800 = vmatprep.mubr.msk.bf16.mxu1 %vm978_vm0, %v977_v0 }
 0x2cb   :  { %v252_v22 = vpop.f32.mrb[4].mxu1 }
 0x2cc   :  { %v790_v23 = vpop.f32.mrb[5].mxu1 }
 0x2cd   :  { %v255_v24 = vpop.f32.mrb[6].mxu1 }
 0x2ce   :  { %v259_v25 = vpack.c.bf16 %v255_v24, %v252_v22  ;;  %v791_v26 = vpop.f32.mrb[7].mxu1 }
 0x2d0   :  { %793 = vmatpush3.bf16.msra.mxu0 %v259_v25 }
 0x2d1   :  { %804 = vmatprep.subr.bf16.mxu0 %v977_v0 }
 0x2d3   :  { %795 = vmatmul.mubr.msk.bf16.vlgmr.msra.gmra.mrb[4].mxu0 %vm155_vm2, %v869_v9 }
 0x2d4   :  { %808 = vmatprep.mubr.msk.bf16.mxu0 %vm978_vm0, %v977_v0  ;;  %805 = vmatpush3.bf16.msra.mxu0 %v1092_v27 }
 0x2d5   :  { %806 = vmatprep.subr.bf16.mxu0 %v977_v0 }
 0x2d8   :  { %807 = vmatpush3.bf16.msra.mxu0 %v874_v40 }
 0x2d9   :  { %820 = vmatprep.subr.bf16.mxu0 %v977_v0 }
 0x3a6   :  { %v298_v29 = vpop.f32.mrb[4].mxu0 }
 0x3a7   :  { %v299_v30 = vadd.f32 %v1099_v28, %v298_v29  ;;  %v796_v31 = vpop.f32.mrb[5].mxu0 }
 0x3a8   :  { %v301_v32 = vpop.f32.mrb[6].mxu0 }
 0x3a9   :  { %v302_v33 = vadd.f32 %v1099_v28, %v301_v32  ;;  %v797_v34 = vpop.f32.mrb[7].mxu0  ;;  %v305_v35 = vmax.f32 %v299_v30, 0.0 }
 0x3ab   :  { %v306_v36 = vmax.f32 %v302_v33, 0.0 }
 0x3ad   :  { %v307_v37 = vpack.c.bf16 %v306_v36, %v305_v35 }
 0x3af   :  { %799 = vmatpush3.bf16.msra.mxu1 %v307_v37 }
 0x3b0   :  { %812 = vmatprep.subr.bf16.mxu1 %v977_v0 }
 0x3b2   :  { %801 = vmatmul.mubr.msk.bf16.vlgmr.msra.gmra.mrb[8].mxu1 %vm155_vm2, %v1106_v38 }
 0x3b3   :  { %813 = vmatpush3.bf16.msra.mxu1 %v1061_v1  ;;  %816 = vmatprep.mubr.msk.bf16.mxu1 %vm978_vm0, %v977_v0 }
 0x3b4   :  { %814 = vmatprep.subr.bf16.mxu1 %v977_v0 }
 0x3b7   :  { %815 = vmatpush3.bf16.msra.mxu1 %v1064_v2 }
 0x3b8   :  { %826 = vmatprep.subr.bf16.mxu1 %v977_v0 }
 0x3ba   :  { %817 = vmatmul.mubr.msk.bf16.vlgmr.msra.gmra.mrb[12].mxu1 %vm100_vm1, %v872_v39 }
 0x3bb   :  { %827 = vmatpush3.bf16.msra.mxu1 %v870_v10  ;;  %830 = vmatprep.mubr.msk.bf16.mxu1 %vm978_vm0, %v977_v0 }
 0x3bc   :  { %828 = vmatprep.subr.bf16.mxu1 %v977_v0 }
 0x3bf   :  { %829 = vmatpush3.bf16.msra.mxu1 %v871_v11 }
 0x3c0   :  { %840 = vmatprep.subr.bf16.mxu1 %v977_v0 }
 0x485   :  { %v345_v41 = vpop.f32.mrb[8].mxu1 }
 0x486   :  { %v351_v42 = vmul.f32 0.11111111, %v345_v41  ;;  %v802_v43 = vpop.f32.mrb[9].mxu1 }
 0x487   :  { %v348_v44 = vpop.f32.mrb[10].mxu1 }
 0x488   :  { %v352_v45 = vpack.c.bf16 %v351_v42, %v351_v42  ;;  %v803_v46 = vpop.f32.mrb[11].mxu1 }
 0x48a   :  { %809 = vmatmul.mubr.msk.bf16.vlgmr.msra.gmra.mrb[8].mxu0 %vm100_vm1, %v352_v45 }
 0x48b   :  { %822 = vmatprep.mubr.msk.bf16.mxu0 %vm978_vm0, %v977_v0 }
 0x48d   :  { %v461_v47 = vpop.f32.mrb[12].mxu1 }
 0x48e   :  { %v818_v48 = vpop.f32.mrb[13].mxu1 }
 0x48f   :  { %v464_v49 = vpop.f32.mrb[14].mxu1 }
 0x490   :  { %v468_v50 = vpack.c.bf16 %v464_v49, %v461_v47  ;;  %v819_v51 = vpop.f32.mrb[15].mxu1 }
 0x492   :  { %821 = vmatpush3.bf16.msra.mxu0 %v468_v50 }
 0x493   :  { %834 = vmatprep.subr.bf16.mxu0 %v977_v0 }
 0x495   :  { %823 = vmatmul.mubr.msk.bf16.vlgmr.msra.gmra.mrb[12].mxu0 %vm155_vm2, %v875_v52 }
 0x496   :  { %836 = vmatprep.mubr.msk.bf16.mxu0 %vm978_vm0, %v977_v0 }
 0x55d   :  { %v406_v54 = vpop.f32.mrb[8].mxu0 }
 0x55e   :  { %v407_v55 = vadd.f32 %v728_v53, %v406_v54  ;;  %v810_v56 = vpop.f32.mrb[9].mxu0 }
 0x55f   :  { %v409_v57 = vpop.f32.mrb[10].mxu0 }
 0x560   :  { %412 = vst [vmem:[#allocation8] sm:$0xff] %v407_v55  ;;  %v811_v58 = vpop.f32.mrb[11].mxu0 }
 0x568   :  { %v511_v59 = vpop.f32.mrb[12].mxu0 }
 0x569   :  { %v512_v60 = vadd.f32 %v1081_v12, %v511_v59  ;;  %v824_v61 = vpop.f32.mrb[13].mxu0 }
 0x56a   :  { %v514_v62 = vpop.f32.mrb[14].mxu0 }
 0x56b   :  { %v515_v63 = vadd.f32 %v1081_v12, %v514_v62  ;;  %v825_v1 = vpop.f32.mrb[15].mxu0  ;;  %v518_v2 = vmax.f32 %v512_v60, 0.0 }
 0x56d   :  { %v519_v3 = vmax.f32 %v515_v63, 0.0 }
 0x56f   :  { %v520_v4 = vpack.c.bf16 %v519_v3, %v518_v2 }
 0x571   :  { %831 = vmatmul.mubr.msk.bf16.vlgmr.msra.gmra.mrb[16].mxu1 %vm100_vm1, %v520_v4 }
 0x572   :  { %842 = vmatprep.mubr.msk.bf16.mxu1 %vm978_vm0, %v977_v0 }
 0x644   :  { %v558_v5 = vpop.f32.mrb[16].mxu1 }
 0x645   :  { %v832_v6 = vpop.f32.mrb[17].mxu1 }
 0x646   :  { %v561_v7 = vpop.f32.mrb[18].mxu1 }
 0x647   :  { %v565_v8 = vpack.c.bf16 %v561_v7, %v558_v5  ;;  %v833_v9 = vpop.f32.mrb[19].mxu1 }
 0x649   :  { %835 = vmatpush3.bf16.msra.mxu0 %v565_v8 }
 0x64a   :  { %846 = vmatprep.subr.bf16.mxu0 %v977_v0 }
 0x64c   :  { %837 = vmatmul.mubr.msk.bf16.vlgmr.msra.gmra.mrb[16].mxu0 %vm155_vm2, %v875_v52 }
 0x64d   :  { %847 = vmatpush3.bf16.msra.mxu0 %v1092_v27  ;;  %850 = vmatprep.mubr.msk.bf16.mxu0 %vm978_vm0, %v977_v0 }
 0x64e   :  { %848 = vmatprep.subr.bf16.mxu0 %v977_v0 }
 0x651   :  { %849 = vmatpush3.bf16.msra.mxu0 %v874_v40 }
 0x71f   :  { %v600_v10 = vpop.f32.mrb[16].mxu0 }
 0x720   :  { %v601_v11 = vadd.f32 %v1099_v28, %v600_v10  ;;  %v838_v12 = vpop.f32.mrb[17].mxu0 }
 0x721   :  { %v603_v13 = vpop.f32.mrb[18].mxu0 }
 0x722   :  { %v604_v14 = vadd.f32 %v1099_v28, %v603_v13  ;;  %v839_v15 = vpop.f32.mrb[19].mxu0  ;;  %v607_v16 = vmax.f32 %v601_v11, 0.0 }
 0x724   :  { %v608_v17 = vmax.f32 %v604_v14, 0.0 }
 0x726   :  { %v609_v18 = vpack.c.bf16 %v608_v17, %v607_v16 }
 0x728   :  { %841 = vmatpush3.bf16.msra.mxu1 %v609_v18 }
 0x72b   :  { %843 = vmatmul.mubr.msk.bf16.vlgmr.msra.gmra.mrb[20].mxu1 %vm155_vm2, %v1106_v38 }
 0x7fe   :  { %v644_v19 = vpop.f32.mrb[20].mxu1 }
 0x7ff   :  { %v650_v20 = vmul.f32 0.11111111, %v644_v19  ;;  %v844_v21 = vpop.f32.mrb[21].mxu1 }
 0x800   :  { %v647_v0 = vpop.f32.mrb[22].mxu1 }
 0x801   :  { %v651_v22 = vpack.c.bf16 %v650_v20, %v650_v20  ;;  %v845_v23 = vpop.f32.mrb[23].mxu1 }
 0x803   :  { %851 = vmatmul.mubr.msk.bf16.vlgmr.msra.gmra.mrb[20].mxu0 %vm100_vm1, %v651_v22 }
 0x8d6   :  { %v689_v24 = vpop.f32.mrb[20].mxu0 }
 0x8d7   :  { %v690_v25 = vadd.f32 %v728_v53, %v689_v24  ;;  %v852_v26 = vpop.f32.mrb[21].mxu0 }
 0x8d8   :  { %v692_v27 = vpop.f32.mrb[22].mxu0 }
 0x8d9   :  { %696 = vst [vmem:[#allocation8 + $0x8] sm:$0xff] %v690_v25  ;;  %v853_v28 = vpop.f32.mrb[23].mxu0 }
 0x8da   :  { %953 = shalt.err (!%p950_p0)
}
 0x8db   :  { %s954_s16 = scalar_lea.hbm %s1166_s5, 256 }
 0x8dc   :  { %p955_p1 = scmp.ne.s32.totalorder %s1166_s5, %s954_s16  ;;  %p958_p2 = scmp.lt.u32.totalorder %s954_s16, %s1166_s5 }
 0x8de   :  { %p960_p3 = pnand %p958_p2, %p955_p1 }
 0x8e0   :  { %963 = shalt.err (!%p960_p3)
}
 0x8e1   :  { %s980_s20 = smov 128   ;;  %s981_s22 = smov 8  }
 0x8e2   :  { %708 = dma.vmem_to_hbm [thread:$0]  %s703_s12, 256, %s1166_s5, [#allocation4], %s980_s20, %s980_s20, %s981_s22  }
 0x8e3   :  { %968 = dma.done.wait [#allocation4], 256  }
 0x8e4   :  { %969 = vsyncadd [#allocation4], 4294967040 }
 0x8e5   :  { %712 = vsyncpa [#allocation3], 1 }
 0x8e6   :  { %713 = vsyncpa [#allocation6], 1 }
 0x8e7   :  { %714 = vsyncpa [#allocation4], 1 }

</bundles_post_ra>
